<compile_context>
chip_gen: v7x
topology: tpu7x:2x2x1
jax: 0.10.0
libtpu: 0.0.40
codegen_flags: <defaults>
</compile_context>

<pallas_src>
import jax
import jax.numpy as jnp
from jax.experimental import pallas as pl
from jax.experimental.pallas import tpu as pltpu


FC1_UNITS = 256
FC2_UNITS = 128


def _round_up(x, m):
    return ((x + m - 1) // m) * m


def _critic_kernel(s_ref, a_ref, w1s_ref, w1a_ref, b1_ref, w2_ref, b2_ref,
                   w3_ref, b3_ref, o_ref, *, compute_dtype):
    # fc1 + relu: two partial contractions (state part + action part), bf16
    # operands with f32 MXU accumulation.  K=33/4 is padded by the compiler.
    h1 = jnp.dot(s_ref[...].astype(compute_dtype), w1s_ref[...],
                 preferred_element_type=jnp.float32)
    h1 = h1 + jnp.dot(a_ref[...].astype(compute_dtype), w1a_ref[...],
                      preferred_element_type=jnp.float32)
    h1 = jnp.maximum(h1 + b1_ref[...], 0.0)

    # fc2 + relu
    h2 = jnp.dot(h1.astype(compute_dtype), w2_ref[...],
                 preferred_element_type=jnp.float32)
    h2 = jnp.maximum(h2 + b2_ref[...], 0.0)

    # fc3: VPU multiply + lane reduction in f32 (w3 passed as a (1, 128) row).
    # Produces the narrow (tb, 1) output directly -> no lane padding written.
    q = jnp.sum(h2 * w3_ref[...], axis=-1, keepdims=True) + b3_ref[...]
    o_ref[...] = q.astype(o_ref.dtype)


def critic_forward(state, action, params, *, batch_tile=2048,
                   compute_dtype=jnp.bfloat16):
    """Fused Critic forward pass. state: (B, S) f32, action: (B, A) f32 -> (B, 1) f32."""
    w1, b1, w2, b2, w3, b3 = params  # weights stored as (in_features, out_features)
    B, S = state.shape
    A = action.shape[1]
    in_features = S + A

    # --- batch tiling: multiple of 16 sublanes; >=2 tiles when B is big so the
    #     'parallel' grid axis spans both v7x TensorCores. ---
    batch_tile = max(16, _round_up(batch_tile, 16))
    tb = min(batch_tile, _round_up(B, 16))
    if B > 256 and tb >= _round_up(B, 16):
        tb = _round_up((tb + 1) // 2, 16)
    b_pad = _round_up(B, tb)

    # Only pad batch rows (zeros) when B is not a multiple of the tile; no
    # concat / lane padding / dtype cast is materialized in HBM.
    if b_pad != B:
        state_in = jnp.zeros((b_pad, S), state.dtype).at[:B].set(state)
        action_in = jnp.zeros((b_pad, A), action.dtype).at[:B].set(action)
    else:
        state_in, action_in = state, action

    # --- weight prep (tiny, resident in VMEM across the whole grid) ---
    w1_s = w1[:S].astype(compute_dtype)          # (S, 256)
    w1_a = w1[S:].astype(compute_dtype)          # (A, 256)
    w2_c = w2.astype(compute_dtype)              # (256, 128)
    b1_c = b1.astype(jnp.float32)                # (1, 256)
    b2_c = b2.astype(jnp.float32)                # (1, 128)
    w3_row = w3.reshape(FC2_UNITS, 1).T.astype(jnp.float32)   # (1, 128), stays f32
    b3_c = b3.reshape(1, 1).astype(jnp.float32)                # (1, 1)

    grid = (b_pad // tb,)

    flops = 2 * B * (in_features * FC1_UNITS + FC1_UNITS * FC2_UNITS + FC2_UNITS)
    bytes_accessed = int(
        B * (in_features + 1) * 4
        + (in_features * FC1_UNITS + FC1_UNITS * FC2_UNITS) * 2
        + (FC1_UNITS + FC2_UNITS * 2 + 1) * 4
    )

    import functools
    kernel = functools.partial(_critic_kernel, compute_dtype=compute_dtype)

    out_p = pl.pallas_call(
        kernel,
        out_shape=jax.ShapeDtypeStruct((b_pad, 1), jnp.float32),
        grid=grid,
        in_specs=[
            pl.BlockSpec((tb, S), lambda i: (i, 0)),             # state: streams over batch
            pl.BlockSpec((tb, A), lambda i: (i, 0)),             # action: streams over batch
            pl.BlockSpec((S, FC1_UNITS), lambda i: (0, 0)),      # weights/biases: resident
            pl.BlockSpec((A, FC1_UNITS), lambda i: (0, 0)),
            pl.BlockSpec((1, FC1_UNITS), lambda i: (0, 0)),
            pl.BlockSpec((FC1_UNITS, FC2_UNITS), lambda i: (0, 0)),
            pl.BlockSpec((1, FC2_UNITS), lambda i: (0, 0)),
            pl.BlockSpec((1, FC2_UNITS), lambda i: (0, 0)),      # w3 row (f32)
            pl.BlockSpec((1, 1), lambda i: (0, 0)),              # b3
        ],
        out_specs=pl.BlockSpec((tb, 1), lambda i: (i, 0)),       # narrow, unpadded Q output
        compiler_params=pltpu.CompilerParams(
            dimension_semantics=("parallel",),   # shard batch tiles across TCs (v7x)
        ),
        cost_estimate=pl.CostEstimate(
            flops=flops, transcendentals=0, bytes_accessed=bytes_accessed),
    )(state_in, action_in, w1_s, w1_a, b1_c, w2_c, b2_c, w3_row, b3_c)

    return out_p[:B]


def init_critic_params(key, state_size, action_size,
                       fc1_units=FC1_UNITS, fc2_units=FC2_UNITS):
    """Deterministic init mirroring Critic.reset_parameters.

    hidden_init(layer) uses weight.size(0) == out_features, so the uniform
    limit is 1/sqrt(out_features) for fc1/fc2; fc3 uses +/- 3e-3.
    Biases keep PyTorch's default Linear bias init: U(-1/sqrt(fan_in), +).
    """
    k = jax.random.split(key, 6)
    in1 = state_size + action_size

    lim1 = 1.0 / (fc1_units ** 0.5)
    lim2 = 1.0 / (fc2_units ** 0.5)
    lim3 = 3e-3

    # Weights stored as (in_features, out_features).
    w1 = jax.random.uniform(k[0], (in1, fc1_units), jnp.float32, -lim1, lim1)
    w2 = jax.random.uniform(k[1], (fc1_units, fc2_units), jnp.float32, -lim2, lim2)
    w3 = jax.random.uniform(k[2], (fc2_units, 1), jnp.float32, -lim3, lim3)

    bl1 = 1.0 / (in1 ** 0.5)
    bl2 = 1.0 / (fc1_units ** 0.5)
    bl3 = 1.0 / (fc2_units ** 0.5)
    b1 = jax.random.uniform(k[3], (1, fc1_units), jnp.float32, -bl1, bl1)
    b2 = jax.random.uniform(k[4], (1, fc2_units), jnp.float32, -bl2, bl2)
    b3 = jax.random.uniform(k[5], (1, 1), jnp.float32, -bl3, bl3)

    return (w1, b1, w2, b2, w3, b3)


def critic_forward_ref(state, action, params):
    """Pure-JAX f32 reference for correctness checking."""
    w1, b1, w2, b2, w3, b3 = params
    xs = jnp.concatenate([state, action], axis=1)
    h1 = jnp.maximum(xs @ w1 + b1, 0.0)
    h2 = jnp.maximum(h1 @ w2 + b2, 0.0)
    return h2 @ w3 + b3


if __name__ == "__main__":
    state_size = 33
    action_size = 4
    batch = 2

    key = jax.random.PRNGKey(0)
    pkey, skey, akey = jax.random.split(key, 3)

    params = init_critic_params(pkey, state_size, action_size)
    state = jax.random.normal(skey, (batch, state_size), dtype=jnp.float32)
    action = jax.random.normal(akey, (batch, action_size), dtype=jnp.float32)

    out = critic_forward(state, action, params)
    jax.block_until_ready(out)

    ref = critic_forward_ref(state, action, params)
    assert out.shape == (batch, 1)
    # bf16 fc1/fc2 operands with f32 accumulation, fully-f32 fc3 head.
    assert jnp.allclose(out, ref, atol=5e-3, rtol=5e-2), (out, ref)

    print("KERNEL_OK")
</pallas_src>

<mosaic_0001>
module attributes {stable_mosaic.version = 11 : i64} {
  func.func @_critic_kernel(%arg0: i32, %arg1: memref<16x33xf32, #tpu.memory_space<vmem>>, %arg2: memref<16x4xf32, #tpu.memory_space<vmem>>, %arg3: memref<33x256xbf16, #tpu.memory_space<vmem>>, %arg4: memref<4x256xbf16, #tpu.memory_space<vmem>>, %arg5: memref<1x256xf32, #tpu.memory_space<vmem>>, %arg6: memref<256x128xbf16, #tpu.memory_space<vmem>>, %arg7: memref<1x128xf32, #tpu.memory_space<vmem>>, %arg8: memref<1x128xf32, #tpu.memory_space<vmem>>, %arg9: memref<1x1xf32, #tpu.memory_space<vmem>>, %arg10: memref<16x1xf32, #tpu.memory_space<vmem>>) attributes {dimension_semantics = [#tpu.dimension_semantics<parallel>], iteration_bounds = array<i64: 1>, scalar_prefetch = 0 : i64, scratch_operands = 0 : i64, tpu.core_type = #tpu.core_type<tc>, window_params = [{transform_indices = @transform_0, window_bounds = array<i64: 16, 33>}, {transform_indices = @transform_1, window_bounds = array<i64: 16, 4>}, {pipeline_mode = #tpu.pipeline_mode<synchronous>, transform_indices = @transform_2, window_bounds = array<i64: 33, 256>}, {pipeline_mode = #tpu.pipeline_mode<synchronous>, transform_indices = @transform_3, window_bounds = array<i64: 4, 256>}, {pipeline_mode = #tpu.pipeline_mode<synchronous>, transform_indices = @transform_4, window_bounds = array<i64: 1, 256>}, {pipeline_mode = #tpu.pipeline_mode<synchronous>, transform_indices = @transform_5, window_bounds = array<i64: 256, 128>}, {pipeline_mode = #tpu.pipeline_mode<synchronous>, transform_indices = @transform_6, window_bounds = array<i64: 1, 128>}, {pipeline_mode = #tpu.pipeline_mode<synchronous>, transform_indices = @transform_7, window_bounds = array<i64: 1, 128>}, {pipeline_mode = #tpu.pipeline_mode<synchronous>, transform_indices = @transform_8, window_bounds = array<i64: 1, 1>}, {transform_indices = @transform_9, window_bounds = array<i64: 16, 1>}]} {
    %c0 = arith.constant 0 : index
    %c0_0 = arith.constant 0 : index
    %0 = vector.load %arg1[%c0, %c0_0] : memref<16x33xf32, #tpu.memory_space<vmem>>, vector<16x33xf32>
    %1 = arith.truncf %0 : vector<16x33xf32> to vector<16x33xbf16>
    %c0_1 = arith.constant 0 : index
    %c0_2 = arith.constant 0 : index
    %2 = vector.load %arg3[%c0_1, %c0_2] : memref<33x256xbf16, #tpu.memory_space<vmem>>, vector<33x256xbf16>
    %cst = arith.constant dense<0.000000e+00> : vector<16x256xf32>
    %3 = tpu.matmul %1, %2, %cst {dimension_numbers = #tpu.dot_dimension_numbers<[1], [0], [0], [1], [0, 0, 1, 1], [], []>} : vector<16x33xbf16>, vector<33x256xbf16>, vector<16x256xf32> -> vector<16x256xf32>
    %c0_3 = arith.constant 0 : index
    %c0_4 = arith.constant 0 : index
    %4 = vector.load %arg2[%c0_3, %c0_4] : memref<16x4xf32, #tpu.memory_space<vmem>>, vector<16x4xf32>
    %5 = arith.truncf %4 : vector<16x4xf32> to vector<16x4xbf16>
    %c0_5 = arith.constant 0 : index
    %c0_6 = arith.constant 0 : index
    %6 = vector.load %arg4[%c0_5, %c0_6] : memref<4x256xbf16, #tpu.memory_space<vmem>>, vector<4x256xbf16>
    %cst_7 = arith.constant dense<0.000000e+00> : vector<16x256xf32>
    %7 = tpu.matmul %5, %6, %cst_7 {dimension_numbers = #tpu.dot_dimension_numbers<[1], [0], [0], [1], [0, 0, 1, 1], [], []>} : vector<16x4xbf16>, vector<4x256xbf16>, vector<16x256xf32> -> vector<16x256xf32>
    %8 = arith.addf %3, %7 : vector<16x256xf32>
    %c0_8 = arith.constant 0 : index
    %c0_9 = arith.constant 0 : index
    %9 = vector.load %arg5[%c0_8, %c0_9] : memref<1x256xf32, #tpu.memory_space<vmem>>, vector<1x256xf32>
    %10 = vector.broadcast %9 : vector<1x256xf32> to vector<16x256xf32>
    %11 = arith.addf %8, %10 : vector<16x256xf32>
    %cst_10 = arith.constant 0.000000e+00 : f32
    %12 = vector.broadcast %cst_10 : f32 to vector<16x256xf32>
    %13 = arith.maximumf %11, %12 : vector<16x256xf32>
    %14 = arith.truncf %13 : vector<16x256xf32> to vector<16x256xbf16>
    %c0_11 = arith.constant 0 : index
    %c0_12 = arith.constant 0 : index
    %15 = vector.load %arg6[%c0_11, %c0_12] : memref<256x128xbf16, #tpu.memory_space<vmem>>, vector<256x128xbf16>
    %cst_13 = arith.constant dense<0.000000e+00> : vector<16x128xf32>
    %16 = tpu.matmul %14, %15, %cst_13 {dimension_numbers = #tpu.dot_dimension_numbers<[1], [0], [0], [1], [0, 0, 1, 1], [], []>} : vector<16x256xbf16>, vector<256x128xbf16>, vector<16x128xf32> -> vector<16x128xf32>
    %c0_14 = arith.constant 0 : index
    %c0_15 = arith.constant 0 : index
    %17 = vector.load %arg7[%c0_14, %c0_15] : memref<1x128xf32, #tpu.memory_space<vmem>>, vector<1x128xf32>
    %18 = vector.broadcast %17 : vector<1x128xf32> to vector<16x128xf32>
    %19 = arith.addf %16, %18 : vector<16x128xf32>
    %cst_16 = arith.constant 0.000000e+00 : f32
    %20 = vector.broadcast %cst_16 : f32 to vector<16x128xf32>
    %21 = arith.maximumf %19, %20 : vector<16x128xf32>
    %c0_17 = arith.constant 0 : index
    %c0_18 = arith.constant 0 : index
    %22 = vector.load %arg8[%c0_17, %c0_18] : memref<1x128xf32, #tpu.memory_space<vmem>>, vector<1x128xf32>
    %23 = vector.broadcast %22 : vector<1x128xf32> to vector<16x128xf32>
    %24 = arith.mulf %21, %23 : vector<16x128xf32>
    %cst_19 = arith.constant dense<0.000000e+00> : vector<16xf32>
    %25 = vector.multi_reduction <add>, %24, %cst_19 [1] : vector<16x128xf32> to vector<16xf32>
    %26 = vector.shape_cast %25 : vector<16xf32> to vector<16x1xf32>
    %c0_20 = arith.constant 0 : index
    %c0_21 = arith.constant 0 : index
    %27 = vector.load %arg9[%c0_20, %c0_21] : memref<1x1xf32, #tpu.memory_space<vmem>>, vector<1x1xf32>
    %28 = vector.broadcast %27 : vector<1x1xf32> to vector<16x1xf32>
    %29 = arith.addf %26, %28 : vector<16x1xf32>
    %c0_22 = arith.constant 0 : index
    %c0_23 = arith.constant 0 : index
    %30 = vector.load %arg10[%c0_22, %c0_23] : memref<16x1xf32, #tpu.memory_space<vmem>>, vector<16x1xf32>
    tpu.vector_store %arg10[%c0_22, %c0_23], %29 {strides = array<i32>} : memref<16x1xf32, #tpu.memory_space<vmem>>, vector<16x1xf32>,
    return
  }
  func.func @transform_0(%arg0: i32) -> (i32, i32) {
    %c0_i32 = arith.constant 0 : i32
    %c0_i32_0 = arith.constant 0 : i32
    return %arg0, %c0_i32 : i32, i32
  }
  func.func @transform_1(%arg0: i32) -> (i32, i32) {
    %c0_i32 = arith.constant 0 : i32
    %c0_i32_0 = arith.constant 0 : i32
    return %arg0, %c0_i32 : i32, i32
  }
  func.func @transform_2(%arg0: i32) -> (i32, i32) {
    %c0_i32 = arith.constant 0 : i32
    %c0_i32_0 = arith.constant 0 : i32
    %c0_i32_1 = arith.constant 0 : i32
    return %c0_i32, %c0_i32_0 : i32, i32
  }
  func.func @transform_3(%arg0: i32) -> (i32, i32) {
    %c0_i32 = arith.constant 0 : i32
    %c0_i32_0 = arith.constant 0 : i32
    %c0_i32_1 = arith.constant 0 : i32
    return %c0_i32, %c0_i32_0 : i32, i32
  }
  func.func @transform_4(%arg0: i32) -> (i32, i32) {
    %c0_i32 = arith.constant 0 : i32
    %c0_i32_0 = arith.constant 0 : i32
    %c0_i32_1 = arith.constant 0 : i32
    return %c0_i32, %c0_i32_0 : i32, i32
  }
  func.func @transform_5(%arg0: i32) -> (i32, i32) {
    %c0_i32 = arith.constant 0 : i32
    %c0_i32_0 = arith.constant 0 : i32
    %c0_i32_1 = arith.constant 0 : i32
    return %c0_i32, %c0_i32_0 : i32, i32
  }
  func.func @transform_6(%arg0: i32) -> (i32, i32) {
    %c0_i32 = arith.constant 0 : i32
    %c0_i32_0 = arith.constant 0 : i32
    %c0_i32_1 = arith.constant 0 : i32
    return %c0_i32, %c0_i32_0 : i32, i32
  }
  func.func @transform_7(%arg0: i32) -> (i32, i32) {
    %c0_i32 = arith.constant 0 : i32
    %c0_i32_0 = arith.constant 0 : i32
    %c0_i32_1 = arith.constant 0 : i32
    return %c0_i32, %c0_i32_0 : i32, i32
  }
  func.func @transform_8(%arg0: i32) -> (i32, i32) {
    %c0_i32 = arith.constant 0 : i32
    %c0_i32_0 = arith.constant 0 : i32
    %c0_i32_1 = arith.constant 0 : i32
    return %c0_i32, %c0_i32_0 : i32, i32
  }
  func.func @transform_9(%arg0: i32) -> (i32, i32) {
    %c0_i32 = arith.constant 0 : i32
    %c0_i32_0 = arith.constant 0 : i32
    return %arg0, %c0_i32 : i32, i32
  }
}

</mosaic_0001>

<bundles_post_ra>
// kernel: tpu_custom_call.1
= control target key start
LH: loop header
LB: loop body
LE: loop exit
PB: predicated region body
PF: predicated region fallthrough
CT: control target
= control target key end

     0   :  { %s698_s0 = inlined_call_operand.vmem [shape: f32[16,33], index: 0, kind: input, shape index: {}]   ;;  %s699_s1 = inlined_call_operand.vmem [shape: f32[16,4], index: 1, kind: input, shape index: {}]   ;;  %s700_s2 = inlined_call_operand.hbm [shape: bf16[33,256], index: 2, kind: input, shape index: {}]   ;;  %s701_s3 = inlined_call_operand.vmem [shape: bf16[4,256], index: 3, kind: input, shape index: {}]   ;;  %s702_s4 = inlined_call_operand.vmem [shape: f32[1,256], index: 4, kind: input, shape index: {}]   ;;  %s703_s5 = inlined_call_operand.hbm [shape: bf16[256,128], index: 5, kind: input, shape index: {}]   ;;  %s704_s6 = inlined_call_operand.vmem [shape: f32[1,128], index: 6, kind: input, shape index: {}]   ;;  %s705_s7 = inlined_call_operand.vmem [shape: f32[1,128], index: 7, kind: input, shape index: {}]   ;;  %s706_s8 = inlined_call_operand.<no memory space> [shape: f32[1,1], index: 8, kind: input, shape index: {}]   ;;  %s707_s9 = inlined_call_operand.vmem [shape: f32[16,1], index: 9, kind: output, shape index: {}]  }
   0x1   :  { %v14_v0 = vstv %s706_s8 }
   0x2   :  { %15 = vst [vmem:[#allocation2] sm:$0x1] %v14_v0 }
   0x3   :  { %16 = vsyncpa [#allocation4], 0 }
   0x4   :  { %17 = vsyncpa [#allocation6], 0  ;;  %s584_s11 = smov [#allocation3]   ;;  %s536_s15 = scalar_lea.hbm %s700_s2, 640 }
   0x5   :  { %s27_s12 = sshll.u32 %s584_s11, 4  ;;  %p537_p0 = scmp.ne.s32.totalorder %s700_s2, %s536_s15  ;;  %s28_s12 = int_to_ptr.vmem [resolvable:$true] %s27_s12 }
   0x6   :  { %p540_p1 = scmp.lt.u32.totalorder %s536_s15, %s700_s2 }
   0x8   :  { %p542_p2 = pnand %p540_p1, %p537_p0 }
   0xa   :  { %545 = shalt.err (!%p542_p2)
}
   0xb   :  { %s546_s8 = scalar_lea.vmem %s28_s12, 640  ;;  %p551_p4 = scmp.lt.s32.totalorder %s28_s12, %s28_s12 }
   0xc   :  { %p547_p3 = scmp.ne.s32.totalorder %s28_s12, %s546_s8  ;;  %p552_p5 = scmp.lt.s32.totalorder %s546_s8, %s546_s8 }
   0xe   :  { %p553_p6 = por %p552_p5, %p551_p4 }
  0x10   :  { %p554_p7 = pnand %p553_p6, %p547_p3 }
  0x12   :  { %557 = shalt.err (!%p554_p7)
}
  0x13   :  { %s585_s20 = smov 128   ;;  %s586_s21 = smov 8  }
  0x14   :  { %33 = dma.hbm_to_vmem [thread:$0]  %s700_s2, 640, %s28_s12, [#allocation4], %s585_s20, %s585_s20, %s586_s21  }
  0x15   :  { %s587_s24 = smov [#allocation5]   ;;  %s558_s28 = scalar_lea.hbm %s703_s5, 2048 }
  0x16   :  { %s43_s25 = sshll.u32 %s587_s24, 4  ;;  %p559_p8 = scmp.ne.s32.totalorder %s703_s5, %s558_s28  ;;  %s44_s25 = int_to_ptr.vmem [resolvable:$true] %s43_s25 }
  0x17   :  { %p562_p9 = scmp.lt.u32.totalorder %s558_s28, %s703_s5 }
  0x19   :  { %p564_p10 = pnand %p562_p9, %p559_p8 }
  0x1b   :  { %567 = shalt.err (!%p564_p10)
}
  0x1c   :  { %s568_s13 = scalar_lea.vmem %s44_s25, 2048  ;;  %p573_p12 = scmp.lt.s32.totalorder %s44_s25, %s44_s25 }
  0x1d   :  { %p569_p11 = scmp.ne.s32.totalorder %s44_s25, %s568_s13  ;;  %p574_p13 = scmp.lt.s32.totalorder %s568_s13, %s568_s13 }
  0x1f   :  { %p575_p0 = por %p574_p13, %p573_p12 }
  0x21   :  { %p576_p1 = pnand %p575_p0, %p569_p11 }
  0x23   :  { %579 = shalt.err (!%p576_p1)
}
  0x24   :  { %s588_s2 = smov 64   ;;  %s589_s12 = smov 4  }
  0x25   :  { %49 = dma.hbm_to_vmem [thread:$0]  %s703_s5, 2048, %s44_s25, [#allocation6], %s588_s2, %s588_s2, %s589_s12  }
  0x26   :  { %580 = dma.done.wait [#allocation4], 640  }
  0x27   :  { %581 = vsyncadd [#allocation4], 4294966656 }
  0x28   :  { %582 = dma.done.wait [#allocation6], 2048  }
  0x29   :  { %583 = vsyncadd [#allocation6], 4294965248  ;;  %v590_v1 = vmov 0   ;;  %vm88_vm0 = vcmask 1041408   ;;  %v71_v5 = vld [vmem:[%s699_s1] sm:$0xff]  ;;  %v72_v6 = vld [vmem:[%s699_s1 + $0x8] sm:$0xff]  ;;  %v221_v37 = vlaneseq }
  0x2a   :  { %127 = vmatprep.mubr.bf16.mxu0 %v590_v1  ;;  %v450_v2 = vld.sshfl [vmem:[%s701_s3] sm:$0x33 pattern:$0x76325410]  ;;  %v515_v8 = vld [vmem:[#allocation3 + $0x4] ss:$8 sps:$4 sm:$0xff]   ;;  %v73_v9 = vpack.c.bf16 %v72_v6, %v71_v5 }
  0x2b   :  { %v83_v3 = vcombine.high %v450_v2, %v450_v2  ;;  %v90_v4 = vsel %vm88_vm0, %v450_v2, 0  ;;  %v70_v7 = vld [vmem:[#allocation3 + $0x20] sm:$0x11]  ;;  %vm167_vm1 = vcmask 1040384   ;;  %vm84_vm2 = vcmask 31744   ;;  %v520_v13 = vld [vmem:[#allocation5 + $0x40] sm:$0xff]  }
  0x2c   :  { %v513_v10 = vld [vmem:[#allocation3] ss:$8 sps:$4 sm:$0xff]   ;;  %v518_v11 = vld [vmem:[#allocation3 + $0x14] ss:$8 sps:$4 sm:$0xff]   ;;  %v458_v12 = vcombine.high %v70_v7, %v70_v7  ;;  %v169_v14 = vsel %vm167_vm1, 65535, %v590_v1  ;;  %479 = vmatprep.subr.bf16.mxu1 %v520_v13  ;;  %v457_v17 = vcombine.low %v70_v7, %v70_v7  ;;  %vm163_vm3 = vcmask 269312  }
  0x2d   :  { %451 = vmatprep.subr.msk.bf16.mxu0 %vm88_vm0, %v83_v3  ;;  %v521_v15 = vld [vmem:[#allocation5] sm:$0xff]   ;;  %v522_v16 = vld [vmem:[#allocation5 + $0x48] sm:$0xff]   ;;  %v524_v21 = vld [vmem:[#allocation5 + $0x50] sm:$0xff]   ;;  %v222_v38 = vshrl.u32 %v221_v37, 7  ;;  %vm441_vm4 = vcmask 7168  }
  0x2e   :  { %96 = vmatpush1.bf16.msra.mxu0 %v90_v4  ;;  %v516_v18 = vld [vmem:[#allocation3 + $0x10] ss:$8 sps:$4 sm:$0xff]   ;;  %v174_v19 = vand.u32 %v458_v12, %v169_v14  ;;  %480 = vmatpush3.bf16.msra.mxu1 %v521_v15  ;;  %v63_v22 = vld [vmem:[%s698_s0] sm:$0xff]  ;;  %v171_v23 = vand.u32 %v457_v17, %v169_v14  ;;  %v64_v24 = vld [vmem:[%s698_s0 + $0x8] sm:$0xff] }
  0x2f   :  { %176 = vmatprep.subr.bf16.mxu0 %v515_v8  ;;  %v523_v20 = vld [vmem:[#allocation5 + $0x8] sm:$0xff]   ;;  %481 = vmatprep.subr.bf16.mxu1 %v522_v16  ;;  %v525_v25 = vld [vmem:[#allocation5 + $0x10] sm:$0xff]   ;;  %v526_v26 = vld [vmem:[#allocation5 + $0x58] sm:$0xff]   ;;  %v65_v27 = vpack.c.bf16 %v64_v24, %v63_v22  ;;  %v223_v39 = vsub.s32 0, %v222_v38  ;;  %v227_v41 = vsub.s32 1, %v222_v38 }
  0x30   :  { %v527_v28 = vld [vmem:[#allocation5 + $0x18] sm:$0xff]   ;;  %v528_v29 = vld [vmem:[#allocation5 + $0x60] sm:$0xff]   ;;  %v530_v31 = vld [vmem:[#allocation5 + $0x68] sm:$0xff]  }
  0x31   :  { %452 = vmatmul.mubr.msk.bf16.vlgmr.msra.gmra.mrb[0].mxu0 %vm84_vm2, %v73_v9  ;;  %v529_v30 = vld [vmem:[#allocation5 + $0x20] sm:$0xff]   ;;  %v531_v32 = vld [vmem:[#allocation5 + $0x28] sm:$0xff]   ;;  %v532_v33 = vld [vmem:[#allocation5 + $0x70] sm:$0xff]  }
  0x32   :  { %177 = vmatpush1.bf16.msra.mxu0 %v513_v10  ;;  %208 = vmatprep.mubr.bf16.mxu0 %v590_v1  ;;  %v533_v34 = vld [vmem:[#allocation5 + $0x30] sm:$0xff]   ;;  %v534_v35 = vld [vmem:[#allocation5 + $0x78] sm:$0xff]  }
  0x33   :  { %178 = vmatprep.subr.bf16.mxu0 %v518_v11  ;;  %482 = vmatpush3.bf16.msra.mxu1 %v523_v20  ;;  %v535_v36 = vld [vmem:[#allocation5 + $0x38] sm:$0xff]   ;;  %v460_v60 = vld [vmem:[%s704_s6] ss:$0 sm:$0xff] }
  0x34   :  { %483 = vmatprep.subr.bf16.mxu1 %v524_v21  ;;  %v219_v40 = vld [vmem:[%s702_s4] sm:$0x3] }
  0x35   :  { %v224_v42 = vrot.slane %v219_v40, %v223_v39  ;;  %v228_v43 = vrot.slane %v219_v40, %v227_v41  ;;  %v477_v2 = vld [vmem:[%s705_s7] ss:$0 sm:$0xff] }
  0x36   :  { %179 = vmatpush1.bf16.msra.mxu0 %v516_v18  ;;  %v478_v8 = vld [vmem:[#allocation2] ss:$0 sm:$0xff] }
  0x37   :  { %180 = vmatprep.subr.bf16.mxu0 %v174_v19  ;;  %484 = vmatpush3.bf16.msra.mxu1 %v525_v25 }
  0x38   :  { %485 = vmatprep.subr.bf16.mxu1 %v526_v26 }
  0x3a   :  { %181 = vmatpush1.bf16.msra.mxu0 %v171_v23 }
  0x3b   :  { %486 = vmatpush3.bf16.msra.mxu1 %v527_v28 }
  0x3c   :  { %487 = vmatprep.subr.bf16.mxu1 %v528_v29 }
  0x3d   :  { %459 = vmatmul.mubr.msk.bf16.vlgmr.msra.gmra.mrb[0].mxu0 %vm163_vm3, %v65_v27 }
  0x3f   :  { %488 = vmatpush3.bf16.msra.mxu1 %v529_v30 }
  0x40   :  { %489 = vmatprep.subr.bf16.mxu1 %v530_v31 }
  0x43   :  { %490 = vmatpush3.bf16.msra.mxu1 %v531_v32 }
  0x44   :  { %491 = vmatprep.subr.bf16.mxu1 %v532_v33 }
  0x47   :  { %492 = vmatpush3.bf16.msra.mxu1 %v533_v34 }
  0x48   :  { %493 = vmatprep.subr.bf16.mxu1 %v534_v35 }
  0x4b   :  { %494 = vmatpush3.bf16.msra.mxu1 %v535_v36 }
 0x110   :  { %v210_v44 = vpop.f32.mrb[0].mxu0 }
 0x111   :  { %v231_v45 = vadd.f32 %v224_v42, %v210_v44  ;;  %v212_v46 = vpop.f32.mrb[1].mxu0 }
 0x112   :  { %v232_v47 = vadd.f32 %v228_v43, %v212_v46  ;;  %v214_v48 = vpop.f32.mrb[2].mxu0 }
 0x113   :  { %v233_v49 = vadd.f32 %v224_v42, %v214_v48  ;;  %v216_v50 = vpop.f32.mrb[3].mxu0  ;;  %v235_v52 = vmax.f32 %v231_v45, 0.0 }
 0x114   :  { %v234_v51 = vadd.f32 %v228_v43, %v216_v50  ;;  %v236_v54 = vmax.f32 %v232_v47, 0.0 }
 0x115   :  { %v237_v53 = vmax.f32 %v233_v49, 0.0 }
 0x116   :  { %v238_v55 = vmax.f32 %v234_v51, 0.0 }
 0x117   :  { %v239_v56 = vpack.c.bf16 %v237_v53, %v235_v52 }
 0x118   :  { %v240_v57 = vpack.c.bf16 %v238_v55, %v236_v54 }
 0x11a   :  { %408 = vmatprep.mubr.bf16.mxu1 %v240_v57 }
 0x11b   :  { %409 = vmatmul.mubr.bf16.vlgmr.msra.gmra.mrb[0].mxu1 %v239_v56 }
 0x1ee   :  { %v495_v58 = vpop.f32.mrb[0].mxu1 }
 0x1ef   :  { %v496_v59 = vpop.f32.mrb[1].mxu1 }
 0x1f0   :  { %v497_v61 = vadd.f32 %v496_v59, %v495_v58  ;;  %v498_v62 = vpop.f32.mrb[2].mxu1 }
 0x1f1   :  { %v499_v63 = vpop.f32.mrb[3].mxu1 }
 0x1f2   :  { %v500_v0 = vadd.f32 %v499_v63, %v498_v62  ;;  %v411_v1 = vadd.f32 %v497_v61, %v460_v60 }
 0x1f4   :  { %v414_v3 = vadd.f32 %v500_v0, %v460_v60  ;;  %v417_v4 = vmax.f32 %v411_v1, 0.0 }
 0x1f6   :  { %v418_v5 = vmax.f32 %v414_v3, 0.0  ;;  %v426_v6 = vmul.f32 %v477_v2, %v417_v4 }
 0x1f8   :  { %428 = vadd.xlane.f32.xlu0 %v426_v6  ;;  %v427_v7 = vmul.f32 %v477_v2, %v418_v5 }
 0x1fc   :  { %430 = vadd.xlane.f32.xlu0 %v427_v7 }
 0x285   :  { %v429_v9 = vpop.xlane.xlu0 %428 }
 0x286   :  { %v439_v10 = vadd.f32 %v478_v8, %v429_v9 }
 0x288   :  { %442 = vst.msk [vmem:[%s707_s9] sm:$0xff] %vm441_vm4, %v439_v10 }
 0x289   :  { %v431_v11 = vpop.xlane.xlu0 %430 }
 0x28a   :  { %v440_v12 = vadd.f32 %v478_v8, %v431_v11 }
 0x28c   :  { %443 = vst.msk [vmem:[%s707_s9 + $0x8] sm:$0xff] %vm441_vm4, %v440_v12 }
 0x28d   :  { %448 = vsyncpa [#allocation4], 1 }
 0x28e   :  { %449 = vsyncpa [#allocation6], 1 }

</bundles_post_ra>
